<compile_context>
chip_gen: v7x
topology: tpu7x:2x2x1
jax: 0.10.0
libtpu: 0.0.40
codegen_flags: <defaults>
</compile_context>

<pallas_src>
import jax
import jax.numpy as jnp
from jax import lax
from jax.experimental import pallas as pl
from jax.experimental.pallas import tpu as pltpu


def _cdiv(a, b):
    return (a + b - 1) // b


def _round_up(x, m):
    return _cdiv(x, m) * m


def _sublane(dtype):
    # sublane tiling requirement by element width (f32: 8, bf16: 16, i8/fp8: 32)
    return {4: 8, 2: 16, 1: 32}.get(jnp.dtype(dtype).itemsize, 8)


def _tpu_budgets():
    """Generation-aware VMEM budgets (bytes)."""
    kind = ""
    try:
        kind = jax.devices()[0].device_kind.lower()
    except Exception:
        pass
    if "v7" in kind or "tpu7" in kind:
        # v7x: 64 MiB physical VMEM per TensorCore.
        return {"vmem_limit": 48 * 1024 * 1024,
                "resident_budget": 40 * 1024 * 1024}
    if "v2" in kind or "v3" in kind:
        return {"vmem_limit": 14 * 1024 * 1024,
                "resident_budget": 10 * 1024 * 1024}
    if "v4" in kind or "v5" in kind or "v6" in kind:
        # 128 MiB physical VMEM: raise the scoped limit and use bigger tiles.
        return {"vmem_limit": 96 * 1024 * 1024,
                "resident_budget": 80 * 1024 * 1024}
    # Unknown device: be conservative (fits every supported generation >= v4).
    return {"vmem_limit": 48 * 1024 * 1024,
            "resident_budget": 40 * 1024 * 1024}


# ---------------------------------------------------------------------------
# Kernels
# ---------------------------------------------------------------------------
def _make_resident_kernel(vchunk, nchunks):
    """Whole table VMEM-resident; chunked one-hot matmul over the vocab."""

    def kernel(ids_ref, emb_ref, out_ref):
        tr, hpad = out_ref.shape
        ids = ids_ref[...]                                          # (tr, 1) i32
        col = lax.broadcasted_iota(jnp.int32, (tr, vchunk), 1)      # hoisted

        def body(c, acc):
            # Shift the (tr, 1) ids instead of the (tr, vchunk) iota (cheaper).
            one_hot = (ids - c * vchunk == col).astype(emb_ref.dtype)
            start = pl.multiple_of(c * vchunk, vchunk)
            chunk = emb_ref[pl.ds(start, vchunk), :]                # (vchunk, hpad)
            return acc + jnp.dot(one_hot, chunk,
                                 preferred_element_type=jnp.float32)

        acc = lax.fori_loop(0, nchunks, body,
                            jnp.zeros((tr, hpad), jnp.float32),
                            unroll=(nchunks <= 4))
        out_ref[...] = acc.astype(out_ref.dtype)                    # dense store

    return kernel


def _make_streaming_kernel(needs_acc):
    """Vocab-tiled reduction; f32 outputs accumulate straight into out_ref."""

    def kernel(ids_ref, emb_ref, out_ref, *scratch):
        acc_ref = scratch[0] if needs_acc else out_ref
        k = pl.program_id(1)

        @pl.when(k == 0)
        def _():
            acc_ref[...] = jnp.zeros_like(acc_ref)

        tr = out_ref.shape[0]
        vk = emb_ref.shape[0]
        ids = ids_ref[...] - k * vk                                 # (tr, 1)
        col = lax.broadcasted_iota(jnp.int32, (tr, vk), 1)
        one_hot = (ids == col).astype(emb_ref.dtype)
        acc_ref[...] += jnp.dot(one_hot, emb_ref[...],
                                preferred_element_type=jnp.float32)

        if needs_acc:
            @pl.when(k == pl.num_programs(1) - 1)
            def _():
                out_ref[...] = acc_ref[...].astype(out_ref.dtype)

    return kernel


# ---------------------------------------------------------------------------
# Wrapper
# ---------------------------------------------------------------------------
def decoder_embedding(source, emb_table, *, tile_rows=256, vocab_tile=512,
                      allow_fast_path=True, force_streaming=False):
    """source: (batch, seq) int ids; emb_table: (vocab, hidden) (row 0 == 0).

    Returns (batch, seq, hidden) embeddings.
    """
    batch, seq = source.shape
    vocab, hidden = emb_table.shape
    n = batch * seq
    budgets = _tpu_budgets()
    table_item = jnp.dtype(emb_table.dtype).itemsize

    # ---- tiny-input fast path: pallas_call fixed overhead dominates there --
    if allow_fast_path and not force_streaming and n * vocab <= (1 << 18):
        return jnp.take(emb_table, source.astype(jnp.int32), axis=0)

    # ---- hidden: pad to a lane-dense multiple of 128 (unmasked stores) -----
    hpad = _round_up(hidden, 128)
    table = emb_table
    if hpad != hidden:
        table = jnp.pad(table, ((0, 0), (0, hpad - hidden)))

    # ---- rows: flatten (batch, seq); guarantee >= 2 tiles when possible ----
    sub = max(8, _sublane(emb_table.dtype))
    tr = max(sub, min(_round_up(tile_rows, sub), _round_up(n, sub)))
    if _round_up(n, tr) // tr < 2 and n > sub:
        tr = _round_up(_cdiv(n, 2), sub)       # feed both v7x TensorCores
    n_pad = _round_up(n, tr)
    ids = source.reshape(n).astype(jnp.int32)
    ids = jnp.pad(ids, (0, n_pad - n)).reshape(n_pad, 1)   # pad id 0 (zero row)

    out_item = table_item

    # ---- path choice: table VMEM-resident vs vocab-streaming ---------------
    vchunk = min(512, _round_up(vocab, 128))
    v_res = _round_up(vocab, vchunk)
    resident_bytes = (2 * v_res * hpad * table_item         # table (dbl-buffered)
                      + 2 * tr * hpad * out_item            # output tiles
                      + tr * hpad * 4 + tr * vchunk * 4     # acc + one-hot temps
                      + 4 * tr * 4)                         # id tiles
    use_resident = (not force_streaming) and resident_bytes <= budgets["resident_budget"]

    if use_resident:
        table_p = (jnp.pad(table, ((0, v_res - vocab), (0, 0)))
                   if v_res != vocab else table)
        nchunks = v_res // vchunk
        out = pl.pallas_call(
            _make_resident_kernel(vchunk, nchunks),
            out_shape=jax.ShapeDtypeStruct((n_pad, hpad), emb_table.dtype),
            grid_spec=pltpu.PrefetchScalarGridSpec(
                num_scalar_prefetch=0,
                grid=(n_pad // tr,),
                in_specs=[
                    pl.BlockSpec((tr, 1), lambda i: (i, 0)),       # token ids
                    # Constant block index -> table DMA'd from HBM once and
                    # kept VMEM-resident for every row tile.
                    pl.BlockSpec((v_res, hpad), lambda i: (0, 0)),
                ],
                out_specs=pl.BlockSpec((tr, hpad), lambda i: (i, 0)),
                scratch_shapes=[],
            ),
            compiler_params=pltpu.CompilerParams(
                dimension_semantics=("parallel",),
                vmem_limit_bytes=budgets["vmem_limit"],
            ),
        )(ids, table_p)
    else:
        # STREAMING path: vocab reduction axis last ("arbitrary").
        # TODO(synk): for very large vocabularies a scalar-prefetch DMA
        # row-gather (memory_space=pl.ANY table) would cut table HBM traffic
        # from (n/tr)*vocab*hidden down to n*hidden bytes.
        vk = _round_up(min(vocab_tile, _round_up(vocab, 128)), 128)
        limit = int(budgets["vmem_limit"] * 0.8)
        while vk > 128:
            step_bytes = (2 * vk * hpad * table_item + 2 * tr * hpad * out_item
                          + tr * hpad * 4 + tr * vk * 4 + 4 * tr * 4)
            if step_bytes <= limit:
                break
            vk = _round_up(vk // 2, 128)
        v_pad = _round_up(vocab, vk)
        table_p = (jnp.pad(table, ((0, v_pad - vocab), (0, 0)))
                   if v_pad != vocab else table)

        needs_acc = jnp.dtype(emb_table.dtype) != jnp.float32
        scratch = [pltpu.VMEM((tr, hpad), jnp.float32)] if needs_acc else []
        out = pl.pallas_call(
            _make_streaming_kernel(needs_acc),
            out_shape=jax.ShapeDtypeStruct((n_pad, hpad), emb_table.dtype),
            grid_spec=pltpu.PrefetchScalarGridSpec(
                num_scalar_prefetch=0,
                grid=(n_pad // tr, v_pad // vk),
                in_specs=[
                    pl.BlockSpec((tr, 1), lambda i, k: (i, 0)),      # token ids
                    pl.BlockSpec((vk, hpad), lambda i, k: (k, 0)),   # table slice
                ],
                out_specs=pl.BlockSpec((tr, hpad), lambda i, k: (i, 0)),
                scratch_shapes=scratch,
            ),
            compiler_params=pltpu.CompilerParams(
                dimension_semantics=("parallel", "arbitrary"),
                vmem_limit_bytes=budgets["vmem_limit"],
            ),
        )(ids, table_p)

    return out[:n, :hidden].reshape(batch, seq, hidden)


class DecoderPallas:
    """Mirrors Decoder.__init__ / forward (the reference forward only embeds)."""

    def __init__(self, hiddenSize, vocabSize, batchSize, key):
        self.hiddenSize = hiddenSize
        self.vocabSize = vocabSize
        self.batchSize = batchSize
        w = jax.random.normal(key, (vocabSize, hiddenSize), dtype=jnp.float32)
        # padding_idx=0: row 0 zeroed, as nn.Embedding does.
        self.embedding = w.at[0].set(0.0)

    def forward(self, source, hidden, cell):
        # hidden / cell are unused by the reference forward body (no LSTM call).
        embedded = decoder_embedding(source, self.embedding)
        return embedded


if __name__ == "__main__":
    key = jax.random.PRNGKey(0)
    k_emb, k_src, k_h, k_c = jax.random.split(key, 4)

    hiddenSize = 96      # not a multiple of 128 -> exercises hidden padding
    vocabSize = 1000     # not a multiple of the vocab tile -> exercises padding
    batchSize = 2
    seqLen = 8

    dec = DecoderPallas(hiddenSize, vocabSize, batchSize, k_emb)

    source = jax.random.randint(k_src, (batchSize, seqLen), 0, vocabSize,
                                dtype=jnp.int32)
    source = source.at[0, 0].set(0)          # exercise padding_idx=0

    hidden = jax.random.normal(k_h, (1, batchSize, hiddenSize), jnp.float32)
    cell = jax.random.normal(k_c, (1, batchSize, hiddenSize), jnp.float32)

    ref = jnp.take(dec.embedding, source, axis=0)

    # 1) VMEM-resident-table Pallas kernel (default Pallas path at these sizes).
    emb_resident = decoder_embedding(source, dec.embedding,
                                     allow_fast_path=False)
    emb_resident = jax.block_until_ready(emb_resident)
    assert emb_resident.shape == (batchSize, seqLen, hiddenSize)
    assert jnp.allclose(emb_resident, ref, atol=1e-5), "resident path mismatch"
    assert jnp.all(emb_resident[0, 0] == 0.0), "padding_idx row must be zero"

    # 2) Streaming (vocab-tiled) Pallas kernel, forced for coverage.
    emb_stream = decoder_embedding(source, dec.embedding,
                                   allow_fast_path=False, force_streaming=True)
    emb_stream = jax.block_until_ready(emb_stream)
    assert jnp.allclose(emb_stream, ref, atol=1e-5), "streaming path mismatch"

    # 3) Module-level forward (may take the tiny-input XLA fast path).
    embedded = jax.block_until_ready(dec.forward(source, hidden, cell))
    assert jnp.allclose(embedded, ref, atol=1e-5), "forward() mismatch"

    print("KERNEL_OK")
</pallas_src>

<mosaic_0001>
module attributes {stable_mosaic.version = 11 : i64} {
  func.func @kernel(%arg0: i32, %arg1: memref<8x1xi32, #tpu.memory_space<vmem>>, %arg2: memref<1024x128xf32, #tpu.memory_space<vmem>>, %arg3: memref<8x128xf32, #tpu.memory_space<vmem>>) attributes {dimension_semantics = [#tpu.dimension_semantics<parallel>], iteration_bounds = array<i64: 2>, scalar_prefetch = 0 : i64, scratch_operands = 0 : i64, tpu.core_type = #tpu.core_type<tc>, window_params = [{transform_indices = @transform_0, window_bounds = array<i64: 8, 1>}, {pipeline_mode = #tpu.pipeline_mode<synchronous>, transform_indices = @transform_1, window_bounds = array<i64: 1024, 128>}, {transform_indices = @transform_2, window_bounds = array<i64: 8, 128>}]} {
    %c0 = arith.constant 0 : index
    %c0_0 = arith.constant 0 : index
    %0 = vector.load %arg1[%c0, %c0_0] : memref<8x1xi32, #tpu.memory_space<vmem>>, vector<8x1xi32>
    %1 = tpu.iota {dimensions = array<i32: 1>} : vector<8x512xi32>
    %cst = arith.constant 0.000000e+00 : f32
    %2 = vector.broadcast %cst : f32 to vector<8x128xf32>
    %c0_i32 = arith.constant 0 : i32
    %c512_i32 = arith.constant 512 : i32
    %3 = arith.muli %c0_i32, %c512_i32 : i32
    %4 = vector.broadcast %3 : i32 to vector<8x1xi32>
    %5 = arith.subi %0, %4 : vector<8x1xi32>
    %6 = vector.broadcast %5 : vector<8x1xi32> to vector<8x512xi32>
    %7 = arith.cmpi eq, %6, %1 : vector<8x512xi32>
    %8 = arith.extui %7 : vector<8x512xi1> to vector<8x512xi32>
    %9 = arith.sitofp %8 : vector<8x512xi32> to vector<8x512xf32>
    %c512_i32_1 = arith.constant 512 : i32
    %10 = arith.muli %c0_i32, %c512_i32_1 : i32
    %11 = tpu.assume_multiple %10, 512 : i32
    %12 = arith.index_cast %11 : i32 to index
    %c0_2 = arith.constant 0 : index
    %13 = vector.load %arg2[%12, %c0_2] : memref<1024x128xf32, #tpu.memory_space<vmem>>, vector<512x128xf32>
    %cst_3 = arith.constant dense<0.000000e+00> : vector<8x128xf32>
    %14 = tpu.matmul %9, %13, %cst_3 {dimension_numbers = #tpu.dot_dimension_numbers<[1], [0], [0], [1], [0, 0, 1, 1], [], []>} : vector<8x512xf32>, vector<512x128xf32>, vector<8x128xf32> -> vector<8x128xf32>
    %15 = arith.addf %2, %14 : vector<8x128xf32>
    %c1_i32 = arith.constant 1 : i32
    %c512_i32_4 = arith.constant 512 : i32
    %16 = arith.muli %c1_i32, %c512_i32_4 : i32
    %17 = vector.broadcast %16 : i32 to vector<8x1xi32>
    %18 = arith.subi %0, %17 : vector<8x1xi32>
    %19 = vector.broadcast %18 : vector<8x1xi32> to vector<8x512xi32>
    %20 = arith.cmpi eq, %19, %1 : vector<8x512xi32>
    %21 = arith.extui %20 : vector<8x512xi1> to vector<8x512xi32>
    %22 = arith.sitofp %21 : vector<8x512xi32> to vector<8x512xf32>
    %c512_i32_5 = arith.constant 512 : i32
    %23 = arith.muli %c1_i32, %c512_i32_5 : i32
    %24 = tpu.assume_multiple %23, 512 : i32
    %25 = arith.index_cast %24 : i32 to index
    %c0_6 = arith.constant 0 : index
    %26 = vector.load %arg2[%25, %c0_6] : memref<1024x128xf32, #tpu.memory_space<vmem>>, vector<512x128xf32>
    %cst_7 = arith.constant dense<0.000000e+00> : vector<8x128xf32>
    %27 = tpu.matmul %22, %26, %cst_7 {dimension_numbers = #tpu.dot_dimension_numbers<[1], [0], [0], [1], [0, 0, 1, 1], [], []>} : vector<8x512xf32>, vector<512x128xf32>, vector<8x128xf32> -> vector<8x128xf32>
    %28 = arith.addf %15, %27 : vector<8x128xf32>
    %c2_i32 = arith.constant 2 : i32
    %c0_8 = arith.constant 0 : index
    %c0_9 = arith.constant 0 : index
    %29 = vector.load %arg3[%c0_8, %c0_9] : memref<8x128xf32, #tpu.memory_space<vmem>>, vector<8x128xf32>
    tpu.vector_store %arg3[%c0_8, %c0_9], %28 {strides = array<i32>} : memref<8x128xf32, #tpu.memory_space<vmem>>, vector<8x128xf32>,
    return
  }
  func.func @transform_0(%arg0: i32) -> (i32, i32) {
    %c0_i32 = arith.constant 0 : i32
    %c0_i32_0 = arith.constant 0 : i32
    return %arg0, %c0_i32 : i32, i32
  }
  func.func @transform_1(%arg0: i32) -> (i32, i32) {
    %c0_i32 = arith.constant 0 : i32
    %c0_i32_0 = arith.constant 0 : i32
    %c0_i32_1 = arith.constant 0 : i32
    return %c0_i32, %c0_i32_0 : i32, i32
  }
  func.func @transform_2(%arg0: i32) -> (i32, i32) {
    %c0_i32 = arith.constant 0 : i32
    %c0_i32_0 = arith.constant 0 : i32
    return %arg0, %c0_i32 : i32, i32
  }
}

</mosaic_0001>

<bundles_post_ra>
// kernel: tpu_custom_call.1
= control target key start
LH: loop header
LB: loop body
LE: loop exit
PB: predicated region body
PF: predicated region fallthrough
CT: control target
= control target key end

     0   :  { %7 = vsyncpa [#allocation3], 0  ;;  %s1315_s0 = inlined_call_operand.vmem [shape: s32[16,1], index: 0, kind: input, shape index: {}]   ;;  %s1316_s1 = inlined_call_operand.hbm [shape: f32[1024,128], index: 1, kind: input, shape index: {}]   ;;  %s1317_s2 = inlined_call_operand.hbm [shape: f32[16,128], index: 2, kind: output, shape index: {}]  }
   0x1   :  { %8 = vsyncpa [#allocation4], 0 }
   0x2   :  { %10 = vsyncpa [#allocation4 + $0x1], 0  ;;  %s1155_s9 = smov 0   ;;  %s1157_s10 = smov 0  }
   0x3   :  { %s1159_s11 = smov 0   ;;  %s1161_s12 = smov 0  }
   0x4 LB: > { %s1176_s13 = sadd.s32 4294967295, %s1132_s12   ;;  %s686_s14 = sadd.s32 4294967294, %s1132_s12   ;;  %s1132_s12 = sphi %s1161_s12, %s1333_s12   ;;  %s1128_s11 = sphi %s1159_s11, %s1332_s11   ;;  %s1124_s10 = sphi %s1157_s10, %s1331_s10   ;;  %s1120_s9 = sphi %s1155_s9, %s1330_s9  }
   0x5   : > { %s1180_s15 = sadd.s32 1, %s1132_s12   ;;  %s70_s16 = sadd.s32 1, %s1128_s11 }
   0x6   : > { %s67_s17 = ssub.s32 %s1132_s12, %s1180_s15  ;;  %p80_p0 = scmp.ne.s32.totalorder %s1128_s11, %s1124_s10 }
   0x7   : > { %p68_p1 = scmp.eq.s32.totalorder %s67_s17, 0  ;;  %p81_p2 = scmp.eq.s32.totalorder %s1176_s13, 1 }
   0x8   : > { %p86_p3 = scmp.ne.s32.totalorder %s1124_s10, %s1120_s9  ;;  %p87_p4 = scmp.eq.s32.totalorder %s686_s14, 1 }
   0x9   : > { %s1191_s18 = scalar_select %p68_p1, %s1128_s11, %s70_s16  }
   0xa   : > { %p1193_p5 = por %p81_p2, %p80_p0  ;;  %p1197_p6 = por %p87_p4, %p86_p3 }
   0xb   : > { %p687_p7 = scmp.ge.s32.totalorder %s1132_s12, 1  ;;  %p94_p8 = scmp.lt.s32.totalorder %s1132_s12, 3 }
   0xc   : > { %s1321_s19 = scalar_select %p1193_p5, 1, 0 }
   0xd   : > { %s1322_s20 = scalar_select %p1197_p6, 1, 0 }
   0xe   : > { %p1318_p9 = scmp.eq.s32.totalorder %s1176_s13, 0  ;;  %p1204_p10 = pnand %p687_p7, %p94_p8 }
   0xf   : > { %s1134_s22 = smov [#allocation2]   ;;  %s1038_s27 = scalar_lea.hbm %s1316_s1, 16384 }
  0x10   : > { %s1323_s21 = scalar_select %p1204_p10, 1, 0 }
  0x11   : > { %s106_s23 = sshll.u32 %s1134_s22, 4  ;;  %p989_p11 = pneg %p1204_p10  ;;  %s107_s23 = int_to_ptr.vmem [resolvable:$true] %s106_s23 }
  0x12   : > { %p1039_p13 = scmp.ne.s32.totalorder %s1316_s1, %s1038_s27  ;;  %p1045_p3 = scmp.lt.u32.totalorder %s1038_s27, %s1316_s1 }
  0x13   : > { %p1212_p12 = pnand %p1318_p9, %p989_p11 }
  0x15   : > { %p1040_p0 = pneg %p1212_p12 }
  0x17   : > { %p1041_p1 = pnand %p1040_p0, %p1039_p13 }
  0x19   : > { %p1042_p2 = pneg %p1041_p1 }
  0x1b   : > { %p1047_p4 = pnand %p1045_p3, %p1042_p2 }
  0x1d   : > { %1050 = shalt.err (!%p1047_p4)
}
  0x1e   : > { %s1051_s4 = scalar_lea.vmem %s107_s23, 16384  ;;  %p1059_p9 = scmp.lt.s32.totalorder %s107_s23, %s107_s23 }
  0x1f   : > { %p1052_p7 = scmp.ne.s32.totalorder %s107_s23, %s1051_s4  ;;  %p1060_p6 = scmp.lt.s32.totalorder %s1051_s4, %s1051_s4 }
  0x21   : > { %p1054_p8 = pnand %p1052_p7, %p1040_p0  ;;  %p1061_p5 = por %p1060_p6, %p1059_p9 }
  0x23   : > { %p1055_p11 = pneg %p1054_p8 }
  0x25   : > { %p1062_p10 = pnand %p1061_p5, %p1055_p11 }
  0x27   : > { %1065 = shalt.err (!%p1062_p10)
}
  0x28   : > { %s1135_s5 = smov 128   ;;  %s1136_s6 = smov 8  }
  0x29   : > { %992 = dma.hbm_to_vmem [thread:$0]  (!%p1212_p12), %s1316_s1, 16384, %s107_s23, [#allocation3], %s1135_s5, %s1135_s5, %s1136_s6  }
  0x2a   : > { %p1325_p13 = scmp.ne.s32.totalorder %s1323_s21, 0 }
  0x2b   : > { %p1326_p1 = scmp.eq.s32.totalorder (!%p1325_p13), %s1176_s13, 0 }
  0x2c   : > { %129 = sbr.rel (%p1325_p13) target bundleno = 456 (0x1c8), region = 28 }
  0x33   : > { %1111 = dma.done.wait (%p1326_p1), [#allocation3], 16384   ;;  %p1327_p0 = pmov %p1326_p1 }
  0x34   : > { %p150_p5 = scmp.lt.s32.totalorder %s1176_s13, 1  ;;  %v1137_v0 = vmov 0   ;;  %v272_v2 = vld [vmem:[#allocation2 + $0x280] sm:$0xff]  ;;  %v273_v3 = vld [vmem:[#allocation2 + $0x288] sm:$0xff]  ;;  %v274_v15 = vld [vmem:[#allocation2 + $0x290] sm:$0xff]  ;;  %s147_s21 = sand.u32 1, %s1124_s10  }
  0x35   : > { %1113 = vsyncadd (%p1327_p0), [#allocation3], 4294950912  ;;  %1037 = vset.pattern.permute.xlu0 %v1137_v0  ;;  %v855_v5 = vpack.c.bf16 %v273_v3, %v272_v2  ;;  %v304_v6 = vld [vmem:[#allocation2 + $0x380] sm:$0xff]  ;;  %v305_v7 = vld [vmem:[#allocation2 + $0x388] sm:$0xff]  ;;  %s692_s24 = sshll.u32 %s147_s21, 3  ;;  %s712_s25 = sshll.u32 %s1176_s13, 7 }
  0x36   : > { %s151_s14 = scalar_select %p150_p5, %s1176_s13, 1  ;;  %v256_v8 = vld [vmem:[#allocation2 + $0x200] sm:$0xff]  ;;  %v887_v9 = vpack.c.bf16 %v305_v7, %v304_v6  ;;  %v257_v10 = vld [vmem:[#allocation2 + $0x208] sm:$0xff]  ;;  %v275_v16 = vld [vmem:[#allocation2 + $0x298] sm:$0xff] }
  0x37   : > { %v288_v11 = vld [vmem:[#allocation2 + $0x300] sm:$0xff]  ;;  %v289_v12 = vld [vmem:[#allocation2 + $0x308] sm:$0xff]  ;;  %856 = vmatprep.subr.bf16.mxu0 %v855_v5  ;;  %v857_v13 = vpack.c.bf16 %v257_v10, %v256_v8  ;;  %v306_v17 = vld [vmem:[#allocation2 + $0x390] sm:$0xff]  ;;  %v859_v18 = vpack.c.bf16 %v275_v16, %v274_v15  ;;  %s149_s26 = scalar_lea.vmem [#allocation5], %s692_s24  ;;  %s1273_s30 = scalar_lea.hbm %s1317_s2, %s712_s25 }
  0x38   : > { %s693_s16 = sshll.u32 %s151_s14, 3  ;;  %v889_v14 = vpack.c.bf16 %v289_v12, %v288_v11  ;;  %888 = vmatprep.subr.bf16.mxu1 %v887_v9  ;;  %v307_v19 = vld [vmem:[#allocation2 + $0x398] sm:$0xff]  ;;  %v258_v20 = vld [vmem:[#allocation2 + $0x210] sm:$0xff]  ;;  %v276_v26 = vld [vmem:[#allocation2 + $0x2a0] sm:$0xff]  ;;  %s615_s27 = sshll.u32 %s149_s26, 4  ;;  %s1275_s27 = int_to_ptr.vmem [resolvable:$true] %s615_s27 }
  0x39   : > { %s153_s23 = scalar_lea.vmem %s1315_s0, %s693_s16  ;;  %v259_v21 = vld [vmem:[#allocation2 + $0x218] sm:$0xff]  ;;  %858 = vmatpush3.bf16.msra.mxu0 %v857_v13  ;;  %v891_v22 = vpack.c.bf16 %v307_v19, %v306_v17  ;;  %v290_v24 = vld [vmem:[#allocation2 + $0x310] sm:$0xff]  ;;  %v277_v28 = vld [vmem:[#allocation2 + $0x2a8] sm:$0xff]  ;;  %s602_s3 = scalar_lea.sflag [#allocation4], %s147_s21 }
  0x3a   : > { %v154_v1 = vld [vmem:[%s153_s23] sm:$0xff]  ;;  %890 = vmatpush3.bf16.msra.mxu1 %v889_v14  ;;  %v861_v23 = vpack.c.bf16 %v259_v21, %v258_v20  ;;  %v291_v25 = vld [vmem:[#allocation2 + $0x318] sm:$0xff]  ;;  %860 = vmatprep.subr.bf16.mxu0 %v859_v18  ;;  %v309_v30 = vld [vmem:[#allocation2 + $0x3a8] sm:$0xff]  ;;  %v863_v31 = vpack.c.bf16 %v277_v28, %v276_v26  ;;  %s1066_s4 = scalar_lea.vmem %s1275_s27, 128  ;;  %p1328_p9 = scmp.ne.s32.totalorder %s1321_s19, 0 }
  0x3b   : > { %v698_v4 = vadd.s32 4294966784, %v154_v1  ;;  %v893_v27 = vpack.c.bf16 %v291_v25, %v290_v24  ;;  %v308_v29 = vld [vmem:[#allocation2 + $0x3a0] sm:$0xff]  ;;  %892 = vmatprep.subr.bf16.mxu1 %v891_v22  ;;  %v261_v34 = vld [vmem:[#allocation2 + $0x228] sm:$0xff]  ;;  %v278_v37 = vld [vmem:[#allocation2 + $0x2b0] sm:$0xff]  ;;  %p1067_p6 = scmp.ne.s32.totalorder %s1275_s27, %s1066_s4  ;;  %s1139_s13 = smov [#allocation5]  }
  0x3c   : > { %v895_v32 = vpack.c.bf16 %v309_v30, %v308_v29  ;;  %v260_v33 = vld [vmem:[#allocation2 + $0x220] sm:$0xff]  ;;  %v293_v36 = vld [vmem:[#allocation2 + $0x328] sm:$0xff]  ;;  %v279_v38 = vld [vmem:[#allocation2 + $0x2b8] sm:$0xff]  ;;  %s1070_s5 = sshll.u32 %s1139_s13, 4  ;;  %s1071_s5 = int_to_ptr.vmem [resolvable:$false] %s1070_s5 }
  0x3d   : > { %241 = vperm.xlu0 %1037, %v698_v4   ;;  %v292_v35 = vld [vmem:[#allocation2 + $0x320] sm:$0xff]  ;;  %862 = vmatpush3.bf16.msra.mxu0 %v861_v23  ;;  %v865_v39 = vpack.c.bf16 %v261_v34, %v260_v33  ;;  %v310_v41 = vld [vmem:[#allocation2 + $0x3b0] sm:$0xff]  ;;  %v311_v42 = vld [vmem:[#allocation2 + $0x3b8] sm:$0xff]  ;;  %v867_v44 = vpack.c.bf16 %v279_v38, %v278_v37  ;;  %p1068_p10 = pnand %p1067_p6, %p1328_p9  ;;  %s1072_s6 = scalar_lea.vmem %s1071_s5, 256 }
  0x3e   : > { %894 = vmatpush3.bf16.msra.mxu1 %v893_v27  ;;  %v897_v40 = vpack.c.bf16 %v293_v36, %v292_v35  ;;  %v262_v43 = vld [vmem:[#allocation2 + $0x230] sm:$0xff]  ;;  %864 = vmatprep.subr.bf16.mxu0 %v863_v31  ;;  %v899_v45 = vpack.c.bf16 %v311_v42, %v310_v41  ;;  %v263_v46 = vld [vmem:[#allocation2 + $0x238] sm:$0xff]  ;;  %v280_v49 = vld [vmem:[#allocation2 + $0x2c0] sm:$0xff]  ;;  %v155_v41 = vlaneseq  ;;  %p1073_p2 = scmp.lt.s32.totalorder %s1275_s27, %s1071_s5  ;;  %p1074_p3 = scmp.lt.s32.totalorder %s1072_s6, %s1066_s4 }
  0x3f   : > { %896 = vmatprep.subr.bf16.mxu1 %v895_v32  ;;  %v294_v47 = vld [vmem:[#allocation2 + $0x330] sm:$0xff]  ;;  %v295_v48 = vld [vmem:[#allocation2 + $0x338] sm:$0xff]  ;;  %v281_v50 = vld [vmem:[#allocation2 + $0x2c8] sm:$0xff]  ;;  %v869_v53 = vpack.c.bf16 %v263_v46, %v262_v43  ;;  %p1069_p12 = pneg %p1068_p10 }
  0x40   : > { %v312_v51 = vld [vmem:[#allocation2 + $0x3c0] sm:$0xff]  ;;  %v313_v52 = vld [vmem:[#allocation2 + $0x3c8] sm:$0xff]  ;;  %v901_v54 = vpack.c.bf16 %v295_v48, %v294_v47  ;;  %v871_v57 = vpack.c.bf16 %v281_v50, %v280_v49  ;;  %v282_v61 = vld [vmem:[#allocation2 + $0x2d0] sm:$0xff]  ;;  %v1243_v42 = vand.u32 127, %v155_v41  ;;  %p1075_p4 = por %p1074_p3, %p1073_p2 }
  0x41   : > { %161 = vperm.xlu0 %1037, %v154_v1   ;;  %866 = vmatpush3.bf16.msra.mxu0 %v865_v39  ;;  %v264_v55 = vld [vmem:[#allocation2 + $0x240] sm:$0xff]  ;;  %v265_v56 = vld [vmem:[#allocation2 + $0x248] sm:$0xff]  ;;  %v903_v58 = vpack.c.bf16 %v313_v52, %v312_v51  ;;  %v283_v62 = vld [vmem:[#allocation2 + $0x2d8] sm:$0xff] }
  0x42   : > { %898 = vmatpush3.bf16.msra.mxu1 %v897_v40  ;;  %868 = vmatprep.subr.bf16.mxu0 %v867_v44  ;;  %v296_v59 = vld [vmem:[#allocation2 + $0x340] sm:$0xff]  ;;  %v297_v60 = vld [vmem:[#allocation2 + $0x348] sm:$0xff]  ;;  %v314_v63 = vld [vmem:[#allocation2 + $0x3d0] sm:$0xff]  ;;  %v873_v1 = vpack.c.bf16 %v265_v56, %v264_v55  ;;  %v875_v5 = vpack.c.bf16 %v283_v62, %v282_v61  ;;  %v157_v48 = vadd.s32 128, %v1243_v42  ;;  %v159_v49 = vadd.s32 384, %v1243_v42  ;;  %p1076_p7 = pnand %p1075_p4, %p1069_p12 }
  0x43   : > { %900 = vmatprep.subr.bf16.mxu1 %v899_v45  ;;  %v315_v0 = vld [vmem:[#allocation2 + $0x3d8] sm:$0xff]  ;;  %v905_v2 = vpack.c.bf16 %v297_v60, %v296_v59  ;;  %v266_v3 = vld [vmem:[#allocation2 + $0x250] sm:$0xff]  ;;  %v284_v9 = vld [vmem:[#allocation2 + $0x2e0] sm:$0xff]  ;;  %v1248_v50 = vadd.s32 256, %v1243_v42 }
  0x44   : > { %v267_v4 = vld [vmem:[#allocation2 + $0x258] sm:$0xff]  ;;  %v907_v6 = vpack.c.bf16 %v315_v0, %v314_v63  ;;  %v298_v7 = vld [vmem:[#allocation2 + $0x350] sm:$0xff]  ;;  %v285_v10 = vld [vmem:[#allocation2 + $0x2e8] sm:$0xff]  ;;  %v1138_v0 = vmov 1.0  }
  0x45   : > { %870 = vmatpush3.bf16.msra.mxu0 %v869_v53  ;;  %v299_v8 = vld [vmem:[#allocation2 + $0x358] sm:$0xff]  ;;  %v316_v11 = vld [vmem:[#allocation2 + $0x3e0] sm:$0xff]  ;;  %v317_v12 = vld [vmem:[#allocation2 + $0x3e8] sm:$0xff]  ;;  %v877_v13 = vpack.c.bf16 %v267_v4, %v266_v3  ;;  %v879_v17 = vpack.c.bf16 %v285_v10, %v284_v9 }
  0x46   : > { %902 = vmatpush3.bf16.msra.mxu1 %v901_v54  ;;  %872 = vmatprep.subr.bf16.mxu0 %v871_v57  ;;  %v909_v14 = vpack.c.bf16 %v299_v8, %v298_v7  ;;  %v268_v15 = vld [vmem:[#allocation2 + $0x260] sm:$0xff]  ;;  %v269_v16 = vld [vmem:[#allocation2 + $0x268] sm:$0xff]  ;;  %v911_v18 = vpack.c.bf16 %v317_v12, %v316_v11  ;;  %v286_v21 = vld [vmem:[#allocation2 + $0x2f0] sm:$0xff] }
  0x47   : > { %904 = vmatprep.subr.bf16.mxu1 %v903_v58  ;;  %v300_v19 = vld [vmem:[#allocation2 + $0x360] sm:$0xff]  ;;  %v301_v20 = vld [vmem:[#allocation2 + $0x368] sm:$0xff]  ;;  %v287_v22 = vld [vmem:[#allocation2 + $0x2f8] sm:$0xff]  ;;  %v881_v25 = vpack.c.bf16 %v269_v16, %v268_v15 }
  0x48   : > { %v318_v23 = vld [vmem:[#allocation2 + $0x3f0] sm:$0xff]  ;;  %v319_v24 = vld [vmem:[#allocation2 + $0x3f8] sm:$0xff]  ;;  %v913_v26 = vpack.c.bf16 %v301_v20, %v300_v19  ;;  %v883_v29 = vpack.c.bf16 %v287_v22, %v286_v21  ;;  %v191_v33 = vld [vmem:[#allocation2 + $0x80] sm:$0xff] }
  0x49   : > { %874 = vmatpush3.bf16.msra.mxu0 %v873_v1  ;;  %v270_v27 = vld [vmem:[#allocation2 + $0x270] sm:$0xff]  ;;  %v271_v28 = vld [vmem:[#allocation2 + $0x278] sm:$0xff]  ;;  %v915_v30 = vpack.c.bf16 %v319_v24, %v318_v23  ;;  %v192_v34 = vld [vmem:[#allocation2 + $0x88] sm:$0xff] }
  0x4a   : > { %906 = vmatpush3.bf16.msra.mxu1 %v905_v2  ;;  %876 = vmatprep.subr.bf16.mxu0 %v875_v5  ;;  %v302_v31 = vld [vmem:[#allocation2 + $0x370] sm:$0xff]  ;;  %v303_v32 = vld [vmem:[#allocation2 + $0x378] sm:$0xff]  ;;  %v223_v35 = vld [vmem:[#allocation2 + $0x180] sm:$0xff]  ;;  %v885_v37 = vpack.c.bf16 %v271_v28, %v270_v27  ;;  %v919_v39 = vpack.c.bf16 %v192_v34, %v191_v33 }
  0x4b   : > { %908 = vmatprep.subr.bf16.mxu1 %v907_v6  ;;  %v224_v36 = vld [vmem:[#allocation2 + $0x188] sm:$0xff]  ;;  %v917_v38 = vpack.c.bf16 %v303_v32, %v302_v31  ;;  %v175_v43 = vld [vmem:[#allocation2] sm:$0xff]  ;;  %v193_v47 = vld [vmem:[#allocation2 + $0x90] sm:$0xff] }
  0x4c   : > { %v951_v40 = vpack.c.bf16 %v224_v36, %v223_v35  ;;  %v176_v44 = vld [vmem:[#allocation2 + $0x8] sm:$0xff]  ;;  %v207_v45 = vld [vmem:[#allocation2 + $0x100] sm:$0xff]  ;;  %v194_v51 = vld [vmem:[#allocation2 + $0x98] sm:$0xff] }
  0x4d   : > { %878 = vmatpush3.bf16.msra.mxu0 %v877_v13  ;;  %v208_v46 = vld [vmem:[#allocation2 + $0x108] sm:$0xff]  ;;  %v225_v52 = vld [vmem:[#allocation2 + $0x190] sm:$0xff]  ;;  %v226_v53 = vld [vmem:[#allocation2 + $0x198] sm:$0xff]  ;;  %v921_v55 = vpack.c.bf16 %v176_v44, %v175_v43  ;;  %v923_v57 = vpack.c.bf16 %v194_v51, %v193_v47 }
  0x4e   : > { %910 = vmatpush3.bf16.msra.mxu1 %v909_v14  ;;  %880 = vmatprep.subr.bf16.mxu0 %v879_v17  ;;  %v953_v56 = vpack.c.bf16 %v208_v46, %v207_v45  ;;  %v955_v58 = vpack.c.bf16 %v226_v53, %v225_v52  ;;  %v177_v59 = vld [vmem:[#allocation2 + $0x10] sm:$0xff]  ;;  %v178_v60 = vld [vmem:[#allocation2 + $0x18] sm:$0xff]  ;;  %v195_v63 = vld [vmem:[#allocation2 + $0xa0] sm:$0xff] }
  0x4f   : > { %912 = vmatprep.subr.bf16.mxu1 %v911_v18  ;;  %v209_v61 = vld [vmem:[#allocation2 + $0x110] sm:$0xff]  ;;  %v210_v62 = vld [vmem:[#allocation2 + $0x118] sm:$0xff]  ;;  %v196_v1 = vld [vmem:[#allocation2 + $0xa8] sm:$0xff]  ;;  %v925_v5 = vpack.c.bf16 %v178_v60, %v177_v59 }
  0x50   : > { %v227_v2 = vld [vmem:[#allocation2 + $0x1a0] sm:$0xff]  ;;  %v228_v3 = vld [vmem:[#allocation2 + $0x1a8] sm:$0xff]  ;;  %v957_v6 = vpack.c.bf16 %v210_v62, %v209_v61  ;;  %v927_v9 = vpack.c.bf16 %v196_v1, %v195_v63  ;;  %v197_v13 = vld [vmem:[#allocation2 + $0xb0] sm:$0xff] }
  0x51   : > { %882 = vmatpush3.bf16.msra.mxu0 %v881_v25  ;;  %v179_v7 = vld [vmem:[#allocation2 + $0x20] sm:$0xff]  ;;  %v180_v8 = vld [vmem:[#allocation2 + $0x28] sm:$0xff]  ;;  %v959_v10 = vpack.c.bf16 %v228_v3, %v227_v2  ;;  %v198_v14 = vld [vmem:[#allocation2 + $0xb8] sm:$0xff] }
  0x52   : > { %914 = vmatpush3.bf16.msra.mxu1 %v913_v26  ;;  %884 = vmatprep.subr.bf16.mxu0 %v883_v29  ;;  %v211_v11 = vld [vmem:[#allocation2 + $0x120] sm:$0xff]  ;;  %v212_v12 = vld [vmem:[#allocation2 + $0x128] sm:$0xff]  ;;  %v229_v15 = vld [vmem:[#allocation2 + $0x1b0] sm:$0xff]  ;;  %v929_v17 = vpack.c.bf16 %v180_v8, %v179_v7  ;;  %v931_v21 = vpack.c.bf16 %v198_v14, %v197_v13 }
  0x53   : > { %916 = vmatprep.subr.bf16.mxu1 %v915_v30  ;;  %v230_v16 = vld [vmem:[#allocation2 + $0x1b8] sm:$0xff]  ;;  %v961_v18 = vpack.c.bf16 %v212_v12, %v211_v11  ;;  %v181_v19 = vld [vmem:[#allocation2 + $0x30] sm:$0xff]  ;;  %v199_v25 = vld [vmem:[#allocation2 + $0xc0] sm:$0xff] }
  0x54   : > { %v182_v20 = vld [vmem:[#allocation2 + $0x38] sm:$0xff]  ;;  %v963_v22 = vpack.c.bf16 %v230_v16, %v229_v15  ;;  %v213_v23 = vld [vmem:[#allocation2 + $0x130] sm:$0xff]  ;;  %v200_v26 = vld [vmem:[#allocation2 + $0xc8] sm:$0xff] }
  0x55   : > { %886 = vmatpush3.bf16.msra.mxu0 %v885_v37  ;;  %v214_v24 = vld [vmem:[#allocation2 + $0x138] sm:$0xff]  ;;  %v231_v27 = vld [vmem:[#allocation2 + $0x1c0] sm:$0xff]  ;;  %v232_v28 = vld [vmem:[#allocation2 + $0x1c8] sm:$0xff]  ;;  %v933_v29 = vpack.c.bf16 %v182_v20, %v181_v19  ;;  %v935_v33 = vpack.c.bf16 %v200_v26, %v199_v25 }
  0x56   : > { %918 = vmatpush3.bf16.msra.mxu1 %v917_v38  ;;  %920 = vmatprep.subr.bf16.mxu0 %v919_v39  ;;  %v965_v30 = vpack.c.bf16 %v214_v24, %v213_v23  ;;  %v183_v31 = vld [vmem:[#allocation2 + $0x40] sm:$0xff]  ;;  %v184_v32 = vld [vmem:[#allocation2 + $0x48] sm:$0xff]  ;;  %v967_v34 = vpack.c.bf16 %v232_v28, %v231_v27  ;;  %v201_v37 = vld [vmem:[#allocation2 + $0xd0] sm:$0xff] }
  0x57   : > { %952 = vmatprep.subr.bf16.mxu1 %v951_v40  ;;  %v215_v35 = vld [vmem:[#allocation2 + $0x140] sm:$0xff]  ;;  %v216_v36 = vld [vmem:[#allocation2 + $0x148] sm:$0xff]  ;;  %v202_v38 = vld [vmem:[#allocation2 + $0xd8] sm:$0xff]  ;;  %v937_v41 = vpack.c.bf16 %v184_v32, %v183_v31 }
  0x58   : > { %v233_v39 = vld [vmem:[#allocation2 + $0x1d0] sm:$0xff]  ;;  %v234_v40 = vld [vmem:[#allocation2 + $0x1d8] sm:$0xff]  ;;  %v969_v43 = vpack.c.bf16 %v216_v36, %v215_v35  ;;  %v939_v46 = vpack.c.bf16 %v202_v38, %v201_v37  ;;  %v203_v51 = vld [vmem:[#allocation2 + $0xe0] sm:$0xff] }
  0x59   : > { %v185_v44 = vld [vmem:[#allocation2 + $0x50] sm:$0xff]  ;;  %v186_v45 = vld [vmem:[#allocation2 + $0x58] sm:$0xff]  ;;  %v971_v47 = vpack.c.bf16 %v234_v40, %v233_v39  ;;  %v204_v52 = vld [vmem:[#allocation2 + $0xe8] sm:$0xff] }
  0x5a   : > { %v235_v53 = vld [vmem:[#allocation2 + $0x1e0] sm:$0xff]  ;;  %v943_v59 = vpack.c.bf16 %v204_v52, %v203_v51  ;;  %v220_v62 = vld [vmem:[#allocation2 + $0x168] sm:$0xff]  ;;  %v205_v63 = vld [vmem:[#allocation2 + $0xf0] sm:$0xff] }
  0x5b   : > { %v219_v61 = vld [vmem:[#allocation2 + $0x160] sm:$0xff]  ;;  %v206_v1 = vld [vmem:[#allocation2 + $0xf8] sm:$0xff]  ;;  %v237_v2 = vld [vmem:[#allocation2 + $0x1f0] sm:$0xff] }
  0x5c   : > { %v238_v3 = vld [vmem:[#allocation2 + $0x1f8] sm:$0xff]  ;;  %v189_v7 = vld [vmem:[#allocation2 + $0x70] sm:$0xff]  ;;  %v947_v8 = vpack.c.bf16 %v206_v1, %v205_v63 }
  0x5d   : > { %v221_v11 = vld [vmem:[#allocation2 + $0x170] sm:$0xff]  ;;  %v222_v12 = vld [vmem:[#allocation2 + $0x178] sm:$0xff] }
  0x5e   : > { %v981_v14 = vpack.c.bf16 %v222_v12, %v221_v11 }
  0xbc   : > { %v242_v54 = vpop.permute.xlu0 %241 }
  0xbd   : > { %vm244_vm0 = vcmp.eq.s32.totalorder %v242_v54, %v157_v48  ;;  %vm246_vm1 = vcmp.eq.s32.totalorder %v242_v54, %v159_v49  ;;  %vm243_vm2 = vcmp.eq.s32.totalorder %v242_v54, %v1243_v42  ;;  %vm245_vm3 = vcmp.eq.s32.totalorder %v242_v54, %v1248_v50  ;;  %v236_v54 = vld [vmem:[#allocation2 + $0x1e8] sm:$0xff] }
  0xbe   : > { %703 = vmatprep.mubr.msk.f32.mxu0 %vm244_vm0, %v1138_v0  ;;  %705 = vmatprep.mubr.msk.f32.mxu1 %vm246_vm1, %v1138_v0  ;;  %v975_v60 = vpack.c.bf16 %v236_v54, %v235_v53 }
  0xbf   : > { %704 = vmatmul.mubr.msk.f32.vlgmr.msra.gmra.mrb[0].mxu0 %vm243_vm2, %v1138_v0  ;;  %706 = vmatmul.mubr.msk.f32.vlgmr.msra.gmra.mrb[0].mxu1 %vm245_vm3, %v1138_v0 }
  0xc0   : > { %922 = vmatpush3.bf16.msra.mxu0 %v921_v55  ;;  %954 = vmatpush3.bf16.msra.mxu1 %v953_v56  ;;  %v1256_v4 = vpop.permute.xlu0 %161  ;;  %v941_v55 = vpack.c.bf16 %v186_v45, %v185_v44 }
  0xc1   : > { %924 = vmatprep.subr.bf16.mxu0 %v923_v57  ;;  %vm164_vm4 = vcmp.eq.s32.totalorder %v1256_v4, %v157_v48  ;;  %956 = vmatprep.subr.bf16.mxu1 %v955_v58  ;;  %vm166_vm5 = vcmp.eq.s32.totalorder %v1256_v4, %v159_v49  ;;  %v217_v48 = vld [vmem:[#allocation2 + $0x150] sm:$0xff]  ;;  %v218_v49 = vld [vmem:[#allocation2 + $0x158] sm:$0xff]  ;;  %v187_v57 = vld [vmem:[#allocation2 + $0x60] sm:$0xff]  ;;  %vm163_vm6 = vcmp.eq.s32.totalorder %v1256_v4, %v1243_v42 }
  0xc2   : > { %707 = vmatprep.mubr.msk.f32.mxu0 %vm164_vm4, %v1138_v0  ;;  %709 = vmatprep.mubr.msk.f32.mxu1 %vm166_vm5, %v1138_v0  ;;  %v973_v56 = vpack.c.bf16 %v218_v49, %v217_v48  ;;  %v188_v58 = vld [vmem:[#allocation2 + $0x68] sm:$0xff]  ;;  %vm165_vm7 = vcmp.eq.s32.totalorder %v1256_v4, %v1248_v50 }
  0xc4   : > { %926 = vmatpush3.bf16.msra.mxu0 %v925_v5  ;;  %958 = vmatpush3.bf16.msra.mxu1 %v957_v6  ;;  %v945_v5 = vpack.c.bf16 %v188_v58, %v187_v57  ;;  %v977_v6 = vpack.c.bf16 %v220_v62, %v219_v61 }
  0xc5   : > { %928 = vmatprep.subr.bf16.mxu0 %v927_v9  ;;  %960 = vmatprep.subr.bf16.mxu1 %v959_v10  ;;  %v979_v9 = vpack.c.bf16 %v238_v3, %v237_v2  ;;  %v190_v10 = vld [vmem:[#allocation2 + $0x78] sm:$0xff] }
  0xc6   : > { %v949_v13 = vpack.c.bf16 %v190_v10, %v189_v7 }
  0xc8   : > { %930 = vmatpush3.bf16.msra.mxu0 %v929_v17  ;;  %962 = vmatpush3.bf16.msra.mxu1 %v961_v18 }
  0xc9   : > { %932 = vmatprep.subr.bf16.mxu0 %v931_v21  ;;  %964 = vmatprep.subr.bf16.mxu1 %v963_v22 }
  0xcc   : > { %934 = vmatpush3.bf16.msra.mxu0 %v933_v29  ;;  %966 = vmatpush3.bf16.msra.mxu1 %v965_v30 }
  0xcd   : > { %936 = vmatprep.subr.bf16.mxu0 %v935_v33  ;;  %968 = vmatprep.subr.bf16.mxu1 %v967_v34 }
  0xd0   : > { %938 = vmatpush3.bf16.msra.mxu0 %v937_v41  ;;  %970 = vmatpush3.bf16.msra.mxu1 %v969_v43 }
  0xd1   : > { %940 = vmatprep.subr.bf16.mxu0 %v939_v46  ;;  %972 = vmatprep.subr.bf16.mxu1 %v971_v47 }
  0xd4   : > { %942 = vmatpush3.bf16.msra.mxu0 %v941_v55  ;;  %974 = vmatpush3.bf16.msra.mxu1 %v973_v56 }
  0xd5   : > { %944 = vmatprep.subr.bf16.mxu0 %v943_v59  ;;  %976 = vmatprep.subr.bf16.mxu1 %v975_v60 }
  0xd8   : > { %946 = vmatpush3.bf16.msra.mxu0 %v945_v5  ;;  %978 = vmatpush3.bf16.msra.mxu1 %v977_v6 }
  0xd9   : > { %948 = vmatprep.subr.bf16.mxu0 %v947_v8  ;;  %980 = vmatprep.subr.bf16.mxu1 %v979_v9 }
  0xdc   : > { %950 = vmatpush3.bf16.msra.mxu0 %v949_v13  ;;  %982 = vmatpush3.bf16.msra.mxu1 %v981_v14 }
  0xdf   : > { %708 = vmatmul.mubr.msk.f32.vlgmr.msra.gmra.mrb[2].mxu0 %vm163_vm6, %v1138_v0  ;;  %710 = vmatmul.mubr.msk.f32.vlgmr.msra.gmra.mrb[2].mxu1 %vm165_vm7, %v1138_v0 }
 0x192   : > { %v747_v15 = vpop.f32.mrb[0].mxu0  ;;  %v782_v16 = vpop.f32.mrb[0].mxu1 }
 0x193   : > { %v748_v17 = vpop.f32.mrb[1].mxu0  ;;  %v783_v18 = vpop.f32.mrb[1].mxu1 }
 0x194   : > { %v749_v19 = vadd.f32 %v748_v17, %v747_v15  ;;  %v784_v20 = vadd.f32 %v783_v18, %v782_v16 }
 0x196   : > { %v457_v21 = vadd.f32 %v784_v20, %v749_v19 }
 0x1b2   : > { %v817_v22 = vpop.f32.mrb[2].mxu0  ;;  %v852_v23 = vpop.f32.mrb[2].mxu1 }
 0x1b3   : > { %v818_v42 = vpop.f32.mrb[3].mxu0  ;;  %v853_v24 = vpop.f32.mrb[3].mxu1 }
 0x1b4   : > { %v819_v50 = vadd.f32 %v818_v42, %v817_v22  ;;  %v854_v4 = vadd.f32 %v853_v24, %v852_v23 }
 0x1b6   : > { %v527_v0 = vadd.f32 %v819_v50, %v457_v21 }
 0x1b8   : > { %v597_v25 = vadd.f32 %v854_v4, %v527_v0 }
 0x1ba   : > { %600 = vst [vmem:[%s149_s26] sm:$0xff] %v597_v25 }
 0x1bb   : > { %1079 = shalt.err (!%p1076_p7)
}
 0x1bc   : > { %s1080_s7 = scalar_lea.hbm %s1273_s30, 128  ;;  %s1084_s16 = scalar_lea.hbm %s1317_s2, 256 }
 0x1bd   : > { %p1081_p8 = scmp.ne.s32.totalorder %s1273_s30, %s1080_s7  ;;  %p1085_p1 = scmp.lt.u32.totalorder %s1273_s30, %s1317_s2 }
 0x1be   : > { %p1086_p0 = scmp.lt.u32.totalorder %s1084_s16, %s1080_s7  ;;  %p1088_p6 = scmp.lt.u32.totalorder %s1080_s7, %s1273_s30 }
 0x1bf   : > { %p1082_p11 = pnand %p1081_p8, %p1328_p9 }
 0x1c0   : > { %p1087_p5 = por %p1086_p0, %p1085_p1 }
 0x1c1   : > { %p1083_p13 = pneg %p1082_p11 }
 0x1c2   : > { %p1089_p10 = por %p1088_p6, %p1087_p5 }
 0x1c4   : > { %p1090_p12 = pnand %p1089_p10, %p1083_p13 }
 0x1c6   : > { %1093 = shalt.err (!%p1090_p12)
}
 0x1c7   : > { %987 = dma.vmem_to_hbm [thread:$0]  (%p1328_p9), %s1275_s27, 128, %s1273_s30, %s602_s3  }
 0x1c8 PF: > { %p999_p2 = scmp.ge.s32.totalorder %s1132_s12, 2  ;;  %s627_s23 = sand.u32 1, %s1120_s9  }
 0x1c9   : > { %p1329_p3 = scmp.ne.s32.totalorder %s1322_s20, 0  ;;  %s628_s21 = scalar_lea.sflag [#allocation4], %s627_s23 }
 0x1cb   : > { %p994_p4 = pnand %p999_p2, %p1329_p3 }
 0x1cd   : > { %1115 = dma.done.wait (!%p994_p4), %s628_s21, 128  }
 0x1ce   : > { %1117 = vsyncadd (!%p994_p4), %s628_s21, 4294967168  ;;  %p13_p7 = scmp.ge.s32.totalorder %s1180_s15, 4   ;;  %s1330_s9 = smov %s1124_s10 }
 0x1cf   : > { %s1331_s10 = smov %s1128_s11  ;;  %s1332_s11 = smov %s1191_s18 }
 0x1d0   : > { %s1333_s12 = smov %s1180_s15  ;;  %15 = sbr.rel (!%p13_p7) target bundleno = 4 (0x4), region = 69 }
 0x1d7   :  { %633 = vsyncpa [#allocation3], 1 }
 0x1d8   :  { %635 = vsyncpa [#allocation3 + $0x1], 1 }
 0x1d9   :  { %636 = vsyncpa [#allocation4], 1 }
 0x1da   :  { %638 = vsyncpa [#allocation4 + $0x1], 1 }

</bundles_post_ra>
